<compile_context>
chip_gen: v7x
topology: tpu7x:2x2x1
jax: 0.10.0
libtpu: 0.0.40
codegen_flags: <defaults>
</compile_context>

<pallas_src>
import jax
import jax.numpy as jnp
from jax.experimental import pallas as pl
from jax.experimental.pallas import tpu as pltpu


def _round_up(x, m):
    return (x + m - 1) // m * m


def _mlp_kernel(x_ref, w1_ref, b1_ref, w2_ref, b2_ref, w3_ref, b3_ref,
                o_ref, acc_ref):
    k = pl.program_id(1)

    @pl.when(k == 0)
    def _():
        acc_ref[...] = jnp.zeros_like(acc_ref)

    # Layer 1 partial product: f32 x tile cast to bf16 on the VPU, bf16 MXU matmul,
    # f32 accumulation in VMEM scratch across the K grid axis.
    acc_ref[...] += jnp.dot(x_ref[...].astype(w1_ref.dtype), w1_ref[...],
                            preferred_element_type=jnp.float32)

    @pl.when(k == pl.num_programs(1) - 1)
    def _():
        # Layer 1 epilogue: bias + ReLU  (Dropout = identity in eval).
        h1 = jnp.maximum(acc_ref[...] + b1_ref[...], 0.0)
        # Layer 2: Linear(128 -> 64) + ReLU  (Dropout = identity in eval).
        h2 = jnp.dot(h1.astype(w2_ref.dtype), w2_ref[...],
                     preferred_element_type=jnp.float32)
        h2 = jnp.maximum(h2 + b2_ref[...], 0.0)
        # Layer 3: Linear(64 -> stim_pad) + Sigmoid.
        h3 = jnp.dot(h2.astype(w3_ref.dtype), w3_ref[...],
                     preferred_element_type=jnp.float32)
        o_ref[...] = jax.nn.sigmoid(h3 + b3_ref[...])


def _block_spec(shape, index_map, buffer_count=None):
    """BlockSpec with optional N-deep buffering; degrades gracefully on older JAX."""
    if buffer_count is not None and hasattr(pl, "Buffered"):
        try:
            return pl.BlockSpec(shape, index_map,
                                pipeline_mode=pl.Buffered(buffer_count))
        except TypeError:
            pass
    return pl.BlockSpec(shape, index_map)


def _vmem_limit_bytes(estimate_bytes):
    """Scoped-VMEM limit: 2x the estimated footprint, floored at 32 MiB and capped
    generation-aware (~75% of physical VMEM: ~48 MiB on v7x, ~96 MiB on v5e/v6e)."""
    floor = 32 * 1024 * 1024
    cap = 100 * 1024 * 1024
    try:
        info = pltpu.get_tpu_info()
        phys = getattr(info, "vmem_capacity_bytes", None)
        if phys:
            cap = min(cap, int(phys) * 3 // 4)
    except Exception:
        pass
    return int(min(cap, max(floor, 2 * int(estimate_bytes))))


def simple_brain_decoder(fmri, params, *, batch_tile=512, max_k_tile=2048,
                         compute_dtype=jnp.bfloat16):
    """Pallas forward pass. fmri: (B, fmri_dim) f32. Returns (B, stimulus_dim) f32."""
    w1, b1, w2, b2, w3, b3 = params
    B, fmri_dim = fmri.shape
    h1_dim = w1.shape[1]          # 128
    stim_dim = w3.shape[1]

    # ---- batch tiling: large, 128-aligned tiles to amortize per-step overhead ----
    tile_b = min(batch_tile, _round_up(B, 128))
    if tile_b >= 256 and _round_up(B, tile_b) == tile_b:
        # keep >= 2 grid steps so the parallel batch axis can shard across both
        # TensorCores on v7x (v5e/v6e have 1 TC: harmless there).
        tile_b = max(128, (tile_b // 2) // 128 * 128)
    B_pad = _round_up(B, tile_b)

    # ---- K tiling over fmri_dim (VMEM-bounded for very large voxel counts) ----
    if fmri_dim <= max_k_tile:
        tile_k = fmri_dim         # full-row block: no K padding, single K step
    else:
        tile_k = max_k_tile       # multiple of 128
    K_pad = _round_up(fmri_dim, tile_k)

    # ---- lane-dense output padding ----
    stim_pad = _round_up(stim_dim, 128)

    x = fmri
    if B_pad != B or K_pad != fmri_dim:
        x = jnp.pad(x, ((0, B_pad - B), (0, K_pad - fmri_dim)))
    # NOTE: x deliberately stays f32 in HBM -- the bf16 cast happens in-kernel.

    w1c = w1.astype(compute_dtype)
    if K_pad != fmri_dim:
        w1c = jnp.pad(w1c, ((0, K_pad - fmri_dim), (0, 0)))
    w2c = w2.astype(compute_dtype)
    w3c = w3.astype(compute_dtype)
    b1f = b1.astype(jnp.float32)
    b2f = b2.astype(jnp.float32)
    b3f = b3.astype(jnp.float32)
    if stim_pad != stim_dim:
        w3c = jnp.pad(w3c, ((0, 0), (0, stim_pad - stim_dim)))
        b3f = jnp.pad(b3f, ((0, 0), (0, stim_pad - stim_dim)))

    grid = (B_pad // tile_b, K_pad // tile_k)

    in_specs = [
        # Streamed activations: tiled over (batch, K); default double-buffered.
        pl.BlockSpec((tile_b, tile_k), lambda i, k: (i, k)),
        # Layer-1 weight: tiled over K only; double-buffered by default.
        pl.BlockSpec((tile_k, h1_dim), lambda i, k: (k, 0)),
        # Grid-invariant small tensors: single-buffered when supported.
        _block_spec(b1f.shape, lambda i, k: (0, 0), buffer_count=1),
        _block_spec(w2c.shape, lambda i, k: (0, 0), buffer_count=1),
        _block_spec(b2f.shape, lambda i, k: (0, 0), buffer_count=1),
        _block_spec(w3c.shape, lambda i, k: (0, 0), buffer_count=1),
        _block_spec(b3f.shape, lambda i, k: (0, 0), buffer_count=1),
    ]
    out_specs = pl.BlockSpec((tile_b, stim_pad), lambda i, k: (i, 0))

    vmem_est = (
        2 * tile_b * tile_k * 4            # x double buffer (f32)
        + 2 * tile_k * h1_dim * 2          # w1 tile (bf16), double buffer
        + 2 * tile_b * stim_pad * 4        # output double buffer (f32)
        + tile_b * h1_dim * 4              # f32 accumulator scratch
        + 2 * (w2c.size + w3c.size) * 2    # small weights
        + 2 * (b1f.size + b2f.size + b3f.size) * 4
    )

    out = pl.pallas_call(
        _mlp_kernel,
        out_shape=jax.ShapeDtypeStruct((B_pad, stim_pad), jnp.float32),
        grid=grid,
        in_specs=in_specs,
        out_specs=out_specs,
        scratch_shapes=[pltpu.VMEM((tile_b, h1_dim), jnp.float32)],
        compiler_params=pltpu.CompilerParams(
            dimension_semantics=("parallel", "arbitrary"),
            vmem_limit_bytes=_vmem_limit_bytes(vmem_est),
        ),
    )(x, w1c, b1f, w2c, b2f, w3c, b3f)

    return out[:B, :stim_dim]


def init_params(key, fmri_dim, stimulus_dim):
    """Deterministic init mimicking nn.Linear default (uniform +/- 1/sqrt(fan_in))."""
    dims = [(fmri_dim, 128), (128, 64), (64, stimulus_dim)]
    params = []
    keys = jax.random.split(key, 2 * len(dims))
    for li, (fan_in, fan_out) in enumerate(dims):
        bound = 1.0 / (fan_in ** 0.5)
        w = jax.random.uniform(keys[2 * li], (fan_in, fan_out),
                               minval=-bound, maxval=bound, dtype=jnp.float32)
        b = jax.random.uniform(keys[2 * li + 1], (1, fan_out),
                               minval=-bound, maxval=bound, dtype=jnp.float32)
        params.extend([w, b])
    return tuple(params)


def _reference_mixed(fmri, params, compute_dtype=jnp.bfloat16):
    """Pure-JAX reference mirroring the kernel's mixed precision exactly."""
    w1, b1, w2, b2, w3, b3 = params
    c = compute_dtype
    h = jnp.dot(fmri.astype(c), w1.astype(c), preferred_element_type=jnp.float32)
    h = jnp.maximum(h + b1, 0.0)
    h = jnp.dot(h.astype(c), w2.astype(c), preferred_element_type=jnp.float32)
    h = jnp.maximum(h + b2, 0.0)
    h = jnp.dot(h.astype(c), w3.astype(c), preferred_element_type=jnp.float32)
    return jax.nn.sigmoid(h + b3)


def _reference_f32(fmri, params):
    w1, b1, w2, b2, w3, b3 = params
    h = jnp.maximum(fmri @ w1 + b1, 0.0)
    h = jnp.maximum(h @ w2 + b2, 0.0)
    return jax.nn.sigmoid(h @ w3 + b3)


if __name__ == "__main__":
    key = jax.random.PRNGKey(0)
    k_x, k_p, k_x2, k_p2 = jax.random.split(key, 4)

    # --- small, module-consistent shapes: batch=8 fMRI vectors of dim 256 -> 32-dim stimulus ---
    B, FMRI_DIM, STIM_DIM = 8, 256, 32
    fmri = jax.random.normal(k_x, (B, FMRI_DIM), dtype=jnp.float32)
    params = init_params(k_p, FMRI_DIM, STIM_DIM)

    out = jax.block_until_ready(simple_brain_decoder(fmri, params))
    assert out.shape == (B, STIM_DIM)
    assert jnp.allclose(out, _reference_mixed(fmri, params), atol=1e-3, rtol=1e-3), \
        "mismatch vs mixed-precision (bf16 MXU / f32 accum) reference"
    assert jnp.allclose(out, _reference_f32(fmri, params), atol=3e-2, rtol=3e-2), \
        "mismatch vs pure-f32 reference beyond bf16 tolerance"

    # --- exercise the tiled path: batch + K padding, 2x2 grid, K accumulation ---
    B2, FMRI2, STIM2 = 160, 200, 10
    fmri2 = jax.random.normal(k_x2, (B2, FMRI2), dtype=jnp.float32)
    params2 = init_params(k_p2, FMRI2, STIM2)
    out2 = jax.block_until_ready(
        simple_brain_decoder(fmri2, params2, batch_tile=128, max_k_tile=128))
    assert out2.shape == (B2, STIM2)
    assert jnp.allclose(out2, _reference_mixed(fmri2, params2), atol=2e-3, rtol=2e-3), \
        "tiled-path mismatch vs mixed-precision reference"
    assert jnp.allclose(out2, _reference_f32(fmri2, params2), atol=3e-2, rtol=3e-2), \
        "tiled-path mismatch vs pure-f32 reference beyond bf16 tolerance"

    print("KERNEL_OK")
</pallas_src>

<mosaic_0001>
module attributes {stable_mosaic.version = 11 : i64} {
  func.func @_mlp_kernel(%arg0: i32, %arg1: i32, %arg2: memref<128x256xf32, #tpu.memory_space<vmem>>, %arg3: memref<256x128xbf16, #tpu.memory_space<vmem>>, %arg4: memref<1x128xf32, #tpu.memory_space<vmem>>, %arg5: memref<128x64xbf16, #tpu.memory_space<vmem>>, %arg6: memref<1x64xf32, #tpu.memory_space<vmem>>, %arg7: memref<64x128xbf16, #tpu.memory_space<vmem>>, %arg8: memref<1x128xf32, #tpu.memory_space<vmem>>, %arg9: memref<128x128xf32, #tpu.memory_space<vmem>>, %arg10: memref<128x128xf32, #tpu.memory_space<vmem>>) attributes {dimension_semantics = [#tpu.dimension_semantics<parallel>, #tpu.dimension_semantics<arbitrary>], iteration_bounds = array<i64: 1, 1>, scalar_prefetch = 0 : i64, scratch_operands = 1 : i64, tpu.core_type = #tpu.core_type<tc>, window_params = [{transform_indices = @transform_0, window_bounds = array<i64: 128, 256>}, {transform_indices = @transform_1, window_bounds = array<i64: 256, 128>}, {pipeline_mode = #tpu.pipeline_mode<synchronous>, transform_indices = @transform_2, window_bounds = array<i64: 1, 128>}, {pipeline_mode = #tpu.pipeline_mode<synchronous>, transform_indices = @transform_3, window_bounds = array<i64: 128, 64>}, {pipeline_mode = #tpu.pipeline_mode<synchronous>, transform_indices = @transform_4, window_bounds = array<i64: 1, 64>}, {pipeline_mode = #tpu.pipeline_mode<synchronous>, transform_indices = @transform_5, window_bounds = array<i64: 64, 128>}, {pipeline_mode = #tpu.pipeline_mode<synchronous>, transform_indices = @transform_6, window_bounds = array<i64: 1, 128>}, {transform_indices = @transform_7, window_bounds = array<i64: 128, 128>}]} {
    %c0_i32 = arith.constant 0 : i32
    %0 = arith.cmpi eq, %arg1, %c0_i32 : i32
    %1 = arith.extui %0 : i1 to i32
    %c0_i32_0 = arith.constant 0 : i32
    %2 = arith.cmpi ne, %1, %c0_i32_0 : i32
    scf.if %2 {
      %cst_10 = arith.constant 0.000000e+00 : f32
      %13 = vector.broadcast %cst_10 : f32 to vector<128x128xf32>
      %c0_11 = arith.constant 0 : index
      %c0_12 = arith.constant 0 : index
      %14 = vector.load %arg10[%c0_11, %c0_12] : memref<128x128xf32, #tpu.memory_space<vmem>>, vector<128x128xf32>
      tpu.vector_store %arg10[%c0_11, %c0_12], %13 {strides = array<i32>} : memref<128x128xf32, #tpu.memory_space<vmem>>, vector<128x128xf32>,
    } else {
    }
    %c0 = arith.constant 0 : index
    %c0_1 = arith.constant 0 : index
    %3 = vector.load %arg10[%c0, %c0_1] : memref<128x128xf32, #tpu.memory_space<vmem>>, vector<128x128xf32>
    %c0_2 = arith.constant 0 : index
    %c0_3 = arith.constant 0 : index
    %4 = vector.load %arg2[%c0_2, %c0_3] : memref<128x256xf32, #tpu.memory_space<vmem>>, vector<128x256xf32>
    %5 = arith.truncf %4 : vector<128x256xf32> to vector<128x256xbf16>
    %c0_4 = arith.constant 0 : index
    %c0_5 = arith.constant 0 : index
    %6 = vector.load %arg3[%c0_4, %c0_5] : memref<256x128xbf16, #tpu.memory_space<vmem>>, vector<256x128xbf16>
    %cst = arith.constant dense<0.000000e+00> : vector<128x128xf32>
    %7 = tpu.matmul %5, %6, %cst {dimension_numbers = #tpu.dot_dimension_numbers<[1], [0], [0], [1], [0, 0, 1, 1], [], []>} : vector<128x256xbf16>, vector<256x128xbf16>, vector<128x128xf32> -> vector<128x128xf32>
    %8 = arith.addf %3, %7 : vector<128x128xf32>
    %c0_6 = arith.constant 0 : index
    %c0_7 = arith.constant 0 : index
    %9 = vector.load %arg10[%c0_6, %c0_7] : memref<128x128xf32, #tpu.memory_space<vmem>>, vector<128x128xf32>
    tpu.vector_store %arg10[%c0_6, %c0_7], %8 {strides = array<i32>} : memref<128x128xf32, #tpu.memory_space<vmem>>, vector<128x128xf32>,
    %c0_i32_8 = arith.constant 0 : i32
    %10 = arith.cmpi eq, %arg1, %c0_i32_8 : i32
    %11 = arith.extui %10 : i1 to i32
    %c0_i32_9 = arith.constant 0 : i32
    %12 = arith.cmpi ne, %11, %c0_i32_9 : i32
    scf.if %12 {
      %c0_10 = arith.constant 0 : index
      %c0_11 = arith.constant 0 : index
      %13 = vector.load %arg10[%c0_10, %c0_11] : memref<128x128xf32, #tpu.memory_space<vmem>>, vector<128x128xf32>
      %c0_12 = arith.constant 0 : index
      %c0_13 = arith.constant 0 : index
      %14 = vector.load %arg4[%c0_12, %c0_13] : memref<1x128xf32, #tpu.memory_space<vmem>>, vector<1x128xf32>
      %15 = vector.broadcast %14 : vector<1x128xf32> to vector<128x128xf32>
      %16 = arith.addf %13, %15 : vector<128x128xf32>
      %cst_14 = arith.constant 0.000000e+00 : f32
      %17 = vector.broadcast %cst_14 : f32 to vector<128x128xf32>
      %18 = arith.maximumf %16, %17 : vector<128x128xf32>
      %19 = arith.truncf %18 : vector<128x128xf32> to vector<128x128xbf16>
      %c0_15 = arith.constant 0 : index
      %c0_16 = arith.constant 0 : index
      %20 = vector.load %arg5[%c0_15, %c0_16] : memref<128x64xbf16, #tpu.memory_space<vmem>>, vector<128x64xbf16>
      %cst_17 = arith.constant dense<0.000000e+00> : vector<128x64xf32>
      %21 = tpu.matmul %19, %20, %cst_17 {dimension_numbers = #tpu.dot_dimension_numbers<[1], [0], [0], [1], [0, 0, 1, 1], [], []>} : vector<128x128xbf16>, vector<128x64xbf16>, vector<128x64xf32> -> vector<128x64xf32>
      %c0_18 = arith.constant 0 : index
      %c0_19 = arith.constant 0 : index
      %22 = vector.load %arg6[%c0_18, %c0_19] : memref<1x64xf32, #tpu.memory_space<vmem>>, vector<1x64xf32>
      %23 = vector.broadcast %22 : vector<1x64xf32> to vector<128x64xf32>
      %24 = arith.addf %21, %23 : vector<128x64xf32>
      %cst_20 = arith.constant 0.000000e+00 : f32
      %25 = vector.broadcast %cst_20 : f32 to vector<128x64xf32>
      %26 = arith.maximumf %24, %25 : vector<128x64xf32>
      %27 = arith.truncf %26 : vector<128x64xf32> to vector<128x64xbf16>
      %c0_21 = arith.constant 0 : index
      %c0_22 = arith.constant 0 : index
      %28 = vector.load %arg7[%c0_21, %c0_22] : memref<64x128xbf16, #tpu.memory_space<vmem>>, vector<64x128xbf16>
      %cst_23 = arith.constant dense<0.000000e+00> : vector<128x128xf32>
      %29 = tpu.matmul %27, %28, %cst_23 {dimension_numbers = #tpu.dot_dimension_numbers<[1], [0], [0], [1], [0, 0, 1, 1], [], []>} : vector<128x64xbf16>, vector<64x128xbf16>, vector<128x128xf32> -> vector<128x128xf32>
      %c0_24 = arith.constant 0 : index
      %c0_25 = arith.constant 0 : index
      %30 = vector.load %arg8[%c0_24, %c0_25] : memref<1x128xf32, #tpu.memory_space<vmem>>, vector<1x128xf32>
      %31 = vector.broadcast %30 : vector<1x128xf32> to vector<128x128xf32>
      %32 = arith.addf %29, %31 : vector<128x128xf32>
      %33 = arith.negf %32 : vector<128x128xf32>
      %34 = math.exp %33 : vector<128x128xf32>
      %cst_26 = arith.constant 1.000000e+00 : f32
      %35 = vector.broadcast %cst_26 : f32 to vector<128x128xf32>
      %36 = arith.addf %35, %34 : vector<128x128xf32>
      %37 = arith.divf %35, %36 : vector<128x128xf32>
      %c0_27 = arith.constant 0 : index
      %c0_28 = arith.constant 0 : index
      %38 = vector.load %arg9[%c0_27, %c0_28] : memref<128x128xf32, #tpu.memory_space<vmem>>, vector<128x128xf32>
      tpu.vector_store %arg9[%c0_27, %c0_28], %37 {strides = array<i32>} : memref<128x128xf32, #tpu.memory_space<vmem>>, vector<128x128xf32>,
    } else {
    }
    return
  }
  func.func @transform_0(%arg0: i32, %arg1: i32) -> (i32, i32) {
    %c0_i32 = arith.constant 0 : i32
    return %arg0, %arg1 : i32, i32
  }
  func.func @transform_1(%arg0: i32, %arg1: i32) -> (i32, i32) {
    %c0_i32 = arith.constant 0 : i32
    %c0_i32_0 = arith.constant 0 : i32
    return %arg1, %c0_i32 : i32, i32
  }
  func.func @transform_2(%arg0: i32, %arg1: i32) -> (i32, i32) {
    %c0_i32 = arith.constant 0 : i32
    %c0_i32_0 = arith.constant 0 : i32
    %c0_i32_1 = arith.constant 0 : i32
    return %c0_i32, %c0_i32_0 : i32, i32
  }
  func.func @transform_3(%arg0: i32, %arg1: i32) -> (i32, i32) {
    %c0_i32 = arith.constant 0 : i32
    %c0_i32_0 = arith.constant 0 : i32
    %c0_i32_1 = arith.constant 0 : i32
    return %c0_i32, %c0_i32_0 : i32, i32
  }
  func.func @transform_4(%arg0: i32, %arg1: i32) -> (i32, i32) {
    %c0_i32 = arith.constant 0 : i32
    %c0_i32_0 = arith.constant 0 : i32
    %c0_i32_1 = arith.constant 0 : i32
    return %c0_i32, %c0_i32_0 : i32, i32
  }
  func.func @transform_5(%arg0: i32, %arg1: i32) -> (i32, i32) {
    %c0_i32 = arith.constant 0 : i32
    %c0_i32_0 = arith.constant 0 : i32
    %c0_i32_1 = arith.constant 0 : i32
    return %c0_i32, %c0_i32_0 : i32, i32
  }
  func.func @transform_6(%arg0: i32, %arg1: i32) -> (i32, i32) {
    %c0_i32 = arith.constant 0 : i32
    %c0_i32_0 = arith.constant 0 : i32
    %c0_i32_1 = arith.constant 0 : i32
    return %c0_i32, %c0_i32_0 : i32, i32
  }
  func.func @transform_7(%arg0: i32, %arg1: i32) -> (i32, i32) {
    %c0_i32 = arith.constant 0 : i32
    %c0_i32_0 = arith.constant 0 : i32
    return %arg0, %c0_i32 : i32, i32
  }
}

</mosaic_0001>

<bundles_post_ra>
// kernel: tpu_custom_call.1
= control target key start
LH: loop header
LB: loop body
LE: loop exit
PB: predicated region body
PF: predicated region fallthrough
CT: control target
= control target key end

     0   :  { %12 = vsyncpa [#allocation4], 0  ;;  %s1496_s0 = inlined_call_operand.hbm [shape: f32[128,256], index: 0, kind: input, shape index: {}]   ;;  %s1497_s1 = inlined_call_operand.hbm [shape: bf16[256,128], index: 1, kind: input, shape index: {}]   ;;  %s1498_s2 = inlined_call_operand.vmem [shape: f32[1,128], index: 2, kind: input, shape index: {}]   ;;  %s1499_s3 = inlined_call_operand.vmem [shape: bf16[128,64], index: 3, kind: input, shape index: {}]   ;;  %s1500_s4 = inlined_call_operand.vmem [shape: f32[1,64], index: 4, kind: input, shape index: {}]   ;;  %s1501_s5 = inlined_call_operand.vmem [shape: bf16[64,128], index: 5, kind: input, shape index: {}]   ;;  %s1502_s6 = inlined_call_operand.vmem [shape: f32[1,128], index: 6, kind: input, shape index: {}]   ;;  %s1503_s7 = inlined_call_operand.hbm [shape: f32[128,128], index: 7, kind: output, shape index: {}]  }
   0x1   :  { %13 = vsyncpa [#allocation7], 0 }
   0x2   :  { %14 = vsyncpa [#allocation5], 0  ;;  %s1322_s24 = smov [#allocation3]   ;;  %s1250_s28 = scalar_lea.hbm %s1496_s0, 4096 }
   0x3   :  { %s20_s25 = sshll.u32 %s1322_s24, 4  ;;  %p1251_p0 = scmp.ne.s32.totalorder %s1496_s0, %s1250_s28  ;;  %s21_s25 = int_to_ptr.vmem [resolvable:$true] %s20_s25 }
   0x4   :  { %p1254_p1 = scmp.lt.u32.totalorder %s1250_s28, %s1496_s0 }
   0x6   :  { %p1256_p2 = pnand %p1254_p1, %p1251_p0 }
   0x8   :  { %1259 = shalt.err (!%p1256_p2)
}
   0x9   :  { %s1260_s10 = scalar_lea.vmem %s21_s25, 4096  ;;  %p1265_p4 = scmp.lt.s32.totalorder %s21_s25, %s21_s25 }
   0xa   :  { %p1261_p3 = scmp.ne.s32.totalorder %s21_s25, %s1260_s10  ;;  %p1266_p5 = scmp.lt.s32.totalorder %s1260_s10, %s1260_s10 }
   0xc   :  { %p1267_p6 = por %p1266_p5, %p1265_p4 }
   0xe   :  { %p1268_p7 = pnand %p1267_p6, %p1261_p3 }
  0x10   :  { %1271 = shalt.err (!%p1268_p7)
}
  0x11   :  { %s1323_s11 = smov 256   ;;  %s1324_s12 = smov 16  }
  0x12   :  { %26 = dma.hbm_to_vmem [thread:$0]  %s1496_s0, 4096, %s21_s25, [#allocation4], %s1323_s11, %s1323_s11, %s1324_s12  }
  0x13   :  { %s1325_s15 = smov [#allocation6]   ;;  %s1272_s19 = scalar_lea.hbm %s1497_s1, 2048 }
  0x14   :  { %s32_s16 = sshll.u32 %s1325_s15, 4  ;;  %p1273_p8 = scmp.ne.s32.totalorder %s1497_s1, %s1272_s19  ;;  %s33_s16 = int_to_ptr.vmem [resolvable:$true] %s32_s16 }
  0x15   :  { %p1276_p9 = scmp.lt.u32.totalorder %s1272_s19, %s1497_s1 }
  0x17   :  { %p1278_p10 = pnand %p1276_p9, %p1273_p8 }
  0x19   :  { %1281 = shalt.err (!%p1278_p10)
}
  0x1a   :  { %s1282_s24 = scalar_lea.vmem %s33_s16, 2048  ;;  %p1287_p12 = scmp.lt.s32.totalorder %s33_s16, %s33_s16 }
  0x1b   :  { %p1283_p11 = scmp.ne.s32.totalorder %s33_s16, %s1282_s24  ;;  %p1288_p13 = scmp.lt.s32.totalorder %s1282_s24, %s1282_s24 }
  0x1d   :  { %p1289_p0 = por %p1288_p13, %p1287_p12 }
  0x1f   :  { %p1290_p1 = pnand %p1289_p0, %p1283_p11 }
  0x21   :  { %1293 = shalt.err (!%p1290_p1)
}
  0x22   :  { %s1326_s0 = smov 64   ;;  %s1327_s25 = smov 4  }
  0x23   :  { %38 = dma.hbm_to_vmem [thread:$0]  %s1497_s1, 2048, %s33_s16, [#allocation7], %s1326_s0, %s1326_s0, %s1327_s25  }
  0x24   :  { %1316 = dma.done.wait [#allocation4], 4096  }
  0x25   :  { %1317 = vsyncadd [#allocation4], 4294963200 }
  0x26   :  { %1318 = dma.done.wait [#allocation7], 2048  }
  0x27   :  { %1319 = vsyncadd [#allocation7], 4294965248  ;;  %v1158_v0 = vld [vmem:[#allocation6 + $0x40] sm:$0xff]   ;;  %v1160_v2 = vld [vmem:[#allocation6 + $0x48] sm:$0xff]   ;;  %vm694_vm0 = vcmask 523264  }
  0x28   :  { %v1159_v1 = vld [vmem:[#allocation6] sm:$0xff]   ;;  %1001 = vmatprep.subr.bf16.mxu0 %v1158_v0  ;;  %v1161_v3 = vld [vmem:[#allocation6 + $0x8] sm:$0xff]   ;;  %v1162_v4 = vld [vmem:[#allocation6 + $0x50] sm:$0xff]  }
  0x29   :  { %1002 = vmatpush3.bf16.msra.mxu0 %v1159_v1  ;;  %v1163_v5 = vld [vmem:[#allocation6 + $0x10] sm:$0xff]   ;;  %v1164_v6 = vld [vmem:[#allocation6 + $0x58] sm:$0xff]   ;;  %v1166_v8 = vld [vmem:[#allocation6 + $0x60] sm:$0xff]  }
  0x2a   :  { %1003 = vmatprep.subr.bf16.mxu0 %v1160_v2  ;;  %v1165_v7 = vld [vmem:[#allocation6 + $0x18] sm:$0xff]   ;;  %v1167_v9 = vld [vmem:[#allocation6 + $0x20] sm:$0xff]   ;;  %v1168_v10 = vld [vmem:[#allocation6 + $0x68] sm:$0xff]  }
  0x2b   :  { %v93_v11 = vld [vmem:[#allocation3 + $0x8] sm:$0xff]  ;;  %v95_v12 = vld [vmem:[#allocation3 + $0x18] sm:$0xff]  ;;  %v1170_v15 = vld [vmem:[#allocation6 + $0x70] sm:$0xff]  }
  0x2c   :  { %v125_v13 = vpack.c.bf16 %v95_v12, %v93_v11  ;;  %v1169_v14 = vld [vmem:[#allocation6 + $0x28] sm:$0xff]   ;;  %v1171_v16 = vld [vmem:[#allocation6 + $0x30] sm:$0xff]   ;;  %v1172_v17 = vld [vmem:[#allocation6 + $0x78] sm:$0xff]  }
  0x2d   :  { %1004 = vmatpush3.bf16.msra.mxu0 %v1161_v3  ;;  %v1173_v18 = vld [vmem:[#allocation6 + $0x38] sm:$0xff]   ;;  %v92_v19 = vld [vmem:[#allocation3] sm:$0xff]  ;;  %v94_v20 = vld [vmem:[#allocation3 + $0x10] sm:$0xff] }
  0x2e   :  { %1005 = vmatprep.subr.bf16.mxu0 %v1162_v4  ;;  %300 = vmatprep.mubr.bf16.mxu0 %v125_v13  ;;  %v97_v21 = vld [vmem:[#allocation3 + $0x28] sm:$0xff]  ;;  %v99_v22 = vld [vmem:[#allocation3 + $0x38] sm:$0xff]  ;;  %v1174_v23 = vld [vmem:[%s1499_s3] sm:$0xff]   ;;  %v124_v26 = vpack.c.bf16 %v94_v20, %v92_v19 }
  0x2f   :  { %v1175_v24 = vld [vmem:[%s1499_s3 + $0x8] sm:$0xff]   ;;  %1093 = vmatprep.subr.bf16.mxu1 %v1174_v23  ;;  %v1176_v25 = vld [vmem:[%s1499_s3 + $0x10] sm:$0xff]   ;;  %v127_v27 = vpack.c.bf16 %v99_v22, %v97_v21  ;;  %v96_v28 = vld [vmem:[#allocation3 + $0x20] sm:$0xff] }
  0x30   :  { %1094 = vmatpush3.bf16.msra.mxu1 %v1174_v23  ;;  %v98_v29 = vld [vmem:[#allocation3 + $0x30] sm:$0xff]  ;;  %v101_v30 = vld [vmem:[#allocation3 + $0x48] sm:$0xff]  ;;  %v103_v31 = vld [vmem:[#allocation3 + $0x58] sm:$0xff] }
  0x31   :  { %1006 = vmatpush3.bf16.msra.mxu0 %v1163_v5  ;;  %1095 = vmatprep.subr.bf16.mxu1 %v1175_v24  ;;  %v126_v32 = vpack.c.bf16 %v98_v29, %v96_v28  ;;  %v129_v33 = vpack.c.bf16 %v103_v31, %v101_v30  ;;  %v100_v34 = vld [vmem:[#allocation3 + $0x40] sm:$0xff]  ;;  %v102_v35 = vld [vmem:[#allocation3 + $0x50] sm:$0xff]  ;;  %v105_v36 = vld [vmem:[#allocation3 + $0x68] sm:$0xff] }
  0x32   :  { %1007 = vmatprep.subr.bf16.mxu0 %v1164_v6  ;;  %v107_v37 = vld [vmem:[#allocation3 + $0x78] sm:$0xff]  ;;  %v128_v38 = vpack.c.bf16 %v102_v35, %v100_v34  ;;  %v104_v40 = vld [vmem:[#allocation3 + $0x60] sm:$0xff]  ;;  %v106_v41 = vld [vmem:[#allocation3 + $0x70] sm:$0xff] }
  0x33   :  { %v131_v39 = vpack.c.bf16 %v107_v37, %v105_v36  ;;  %v109_v42 = vld [vmem:[#allocation3 + $0x88] sm:$0xff]  ;;  %v111_v43 = vld [vmem:[#allocation3 + $0x98] sm:$0xff]  ;;  %v130_v44 = vpack.c.bf16 %v106_v41, %v104_v40  ;;  %v108_v46 = vld [vmem:[#allocation3 + $0x80] sm:$0xff] }
  0x34   :  { %1096 = vmatpush3.bf16.msra.mxu1 %v1175_v24  ;;  %v133_v45 = vpack.c.bf16 %v111_v43, %v109_v42  ;;  %v110_v47 = vld [vmem:[#allocation3 + $0x90] sm:$0xff]  ;;  %v113_v48 = vld [vmem:[#allocation3 + $0xa8] sm:$0xff]  ;;  %v115_v49 = vld [vmem:[#allocation3 + $0xb8] sm:$0xff] }
  0x35   :  { %1008 = vmatpush3.bf16.msra.mxu0 %v1165_v7  ;;  %1097 = vmatprep.subr.bf16.mxu1 %v1176_v25  ;;  %v132_v50 = vpack.c.bf16 %v110_v47, %v108_v46  ;;  %v135_v51 = vpack.c.bf16 %v115_v49, %v113_v48  ;;  %v112_v52 = vld [vmem:[#allocation3 + $0xa0] sm:$0xff]  ;;  %v114_v53 = vld [vmem:[#allocation3 + $0xb0] sm:$0xff]  ;;  %v117_v54 = vld [vmem:[#allocation3 + $0xc8] sm:$0xff] }
  0x36   :  { %1009 = vmatprep.subr.bf16.mxu0 %v1166_v8  ;;  %v119_v55 = vld [vmem:[#allocation3 + $0xd8] sm:$0xff]  ;;  %v134_v56 = vpack.c.bf16 %v114_v53, %v112_v52  ;;  %v116_v58 = vld [vmem:[#allocation3 + $0xc0] sm:$0xff]  ;;  %v118_v59 = vld [vmem:[#allocation3 + $0xd0] sm:$0xff] }
  0x37   :  { %v137_v57 = vpack.c.bf16 %v119_v55, %v117_v54  ;;  %v121_v60 = vld [vmem:[#allocation3 + $0xe8] sm:$0xff]  ;;  %v123_v61 = vld [vmem:[#allocation3 + $0xf8] sm:$0xff]  ;;  %v136_v62 = vpack.c.bf16 %v118_v59, %v116_v58  ;;  %v120_v0 = vld [vmem:[#allocation3 + $0xe0] sm:$0xff] }
  0x38   :  { %1098 = vmatpush3.bf16.msra.mxu1 %v1176_v25  ;;  %v139_v63 = vpack.c.bf16 %v123_v61, %v121_v60  ;;  %v122_v1 = vld [vmem:[#allocation3 + $0xf0] sm:$0xff]  ;;  %v1177_v3 = vld [vmem:[%s1499_s3 + $0x18] sm:$0xff]   ;;  %v1178_v4 = vld [vmem:[%s1499_s3 + $0x20] sm:$0xff]  }
  0x39   :  { %1010 = vmatpush3.bf16.msra.mxu0 %v1167_v9  ;;  %v138_v2 = vpack.c.bf16 %v122_v1, %v120_v0  ;;  %1099 = vmatprep.subr.bf16.mxu1 %v1177_v3  ;;  %v1179_v5 = vld [vmem:[%s1499_s3 + $0x28] sm:$0xff]   ;;  %v1180_v6 = vld [vmem:[%s1499_s3 + $0x30] sm:$0xff]   ;;  %v1181_v7 = vld [vmem:[%s1499_s3 + $0x38] sm:$0xff]  }
  0x3a   :  { %1011 = vmatprep.subr.bf16.mxu0 %v1168_v10  ;;  %v1182_v8 = vld [vmem:[%s1501_s5] sm:$0xff]   ;;  %v1183_v36 = vld [vmem:[%s1501_s5 + $0x8] sm:$0xff]  }
  0x3b   :  { %v1425_v11 = vld [vmem:[%s1498_s2] ss:$0 sm:$0xff] }
  0x3c   :  { %1100 = vmatpush3.bf16.msra.mxu1 %v1177_v3 }
  0x3d   :  { %1012 = vmatpush3.bf16.msra.mxu0 %v1169_v14  ;;  %1101 = vmatprep.subr.bf16.mxu1 %v1178_v4 }
  0x3e   :  { %1013 = vmatprep.subr.bf16.mxu0 %v1170_v15 }
  0x40   :  { %1102 = vmatpush3.bf16.msra.mxu1 %v1178_v4 }
  0x41   :  { %1014 = vmatpush3.bf16.msra.mxu0 %v1171_v16  ;;  %1103 = vmatprep.subr.bf16.mxu1 %v1179_v5 }
  0x42   :  { %1015 = vmatprep.subr.bf16.mxu0 %v1172_v17 }
  0x44   :  { %1104 = vmatpush3.bf16.msra.mxu1 %v1179_v5 }
  0x45   :  { %1016 = vmatpush3.bf16.msra.mxu0 %v1173_v18  ;;  %1105 = vmatprep.subr.bf16.mxu1 %v1180_v6 }
  0x48   :  { %301 = vmatmul.mubr.bf16.vlgmr.msra.gmra.mrb[0].mxu0 %v124_v26  ;;  %1106 = vmatpush3.bf16.msra.mxu1 %v1180_v6 }
  0x49   :  { %308 = vmatprep.mubr.bf16.mxu0 %v127_v27  ;;  %1107 = vmatprep.subr.bf16.mxu1 %v1181_v7 }
  0x4c   :  { %1108 = vmatpush3.bf16.msra.mxu1 %v1181_v7 }
  0x4d   :  { %1125 = vmatprep.subr.bf16.mxu1 %v1182_v8 }
  0x50   :  { %309 = vmatmul.mubr.bf16.gmra.mrb[4].mxu0 %v126_v32 }
  0x51   :  { %316 = vmatprep.mubr.bf16.mxu0 %v129_v33 }
  0x58   :  { %317 = vmatmul.mubr.bf16.gmra.mrb[8].mxu0 %v128_v38 }
  0x59   :  { %324 = vmatprep.mubr.bf16.mxu0 %v131_v39 }
  0x60   :  { %325 = vmatmul.mubr.bf16.gmra.mrb[12].mxu0 %v130_v44 }
  0x61   :  { %332 = vmatprep.mubr.bf16.mxu0 %v133_v45 }
  0x68   :  { %333 = vmatmul.mubr.bf16.gmra.mrb[16].mxu0 %v132_v50 }
  0x69   :  { %340 = vmatprep.mubr.bf16.mxu0 %v135_v51 }
  0x70   :  { %341 = vmatmul.mubr.bf16.gmra.mrb[20].mxu0 %v134_v56 }
  0x71   :  { %348 = vmatprep.mubr.bf16.mxu0 %v137_v57 }
  0x78   :  { %349 = vmatmul.mubr.bf16.gmra.mrb[24].mxu0 %v136_v62 }
  0x79   :  { %356 = vmatprep.mubr.bf16.mxu0 %v139_v63 }
  0x80   :  { %357 = vmatmul.mubr.bf16.gmra.mrb[28].mxu0 %v138_v2 }
 0x11b   :  { %v1017_v9 = vpop.f32.mrb[0].mxu0 }
 0x11c   :  { %v1018_v10 = vpop.f32.mrb[1].mxu0 }
 0x11d   :  { %v1019_v12 = vadd.f32 %v1018_v10, %v1017_v9  ;;  %v1020_v13 = vpop.f32.mrb[2].mxu0 }
 0x11e   :  { %v1021_v14 = vpop.f32.mrb[3].mxu0 }
 0x11f   :  { %v1022_v15 = vadd.f32 %v1021_v14, %v1020_v13  ;;  %v423_v16 = vadd.f32 %v1019_v12, %v1425_v11 }
 0x121   :  { %v424_v17 = vadd.f32 %v1022_v15, %v1425_v11  ;;  %v439_v19 = vmax.f32 %v423_v16, 0.0 }
 0x123   :  { %v1023_v18 = vpop.f32.mrb[4].mxu0  ;;  %v440_v20 = vmax.f32 %v424_v17, 0.0 }
 0x124   :  { %v1024_v21 = vpop.f32.mrb[5].mxu0 }
 0x125   :  { %v1025_v22 = vadd.f32 %v1024_v21, %v1023_v18  ;;  %v1026_v23 = vpop.f32.mrb[6].mxu0  ;;  %v455_v24 = vpack.c.bf16 %v440_v20, %v439_v19 }
 0x126   :  { %v1027_v25 = vpop.f32.mrb[7].mxu0 }
 0x127   :  { %v425_v26 = vadd.f32 %v1025_v22, %v1425_v11  ;;  %v1028_v27 = vadd.f32 %v1027_v25, %v1026_v23  ;;  %1109 = vmatprep.mubr.bf16.mxu1 %v455_v24 }
 0x129   :  { %v426_v28 = vadd.f32 %v1028_v27, %v1425_v11  ;;  %v441_v29 = vmax.f32 %v425_v26, 0.0 }
 0x12b   :  { %v442_v30 = vmax.f32 %v426_v28, 0.0  ;;  %v1029_v31 = vpop.f32.mrb[8].mxu0 }
 0x12c   :  { %v1030_v32 = vpop.f32.mrb[9].mxu0 }
 0x12d   :  { %v1031_v33 = vadd.f32 %v1030_v32, %v1029_v31  ;;  %v1032_v34 = vpop.f32.mrb[10].mxu0  ;;  %v456_v35 = vpack.c.bf16 %v442_v30, %v441_v29 }
 0x12e   :  { %v1033_v37 = vpop.f32.mrb[11].mxu0 }
 0x12f   :  { %v427_v38 = vadd.f32 %v1031_v33, %v1425_v11  ;;  %v1034_v39 = vadd.f32 %v1033_v37, %v1032_v34  ;;  %1110 = vmatmul.mubr.bf16.vlgmr.msra.gmra.mrb[0].mxu1 %v456_v35  ;;  %v1185_v37 = vld [vmem:[%s1501_s5 + $0x18] sm:$0xff]  }
 0x130   :  { %1126 = vmatpush3.bf16.msra.mxu1 %v1182_v8 }
 0x131   :  { %v428_v40 = vadd.f32 %v1034_v39, %v1425_v11  ;;  %1127 = vmatprep.subr.bf16.mxu1 %v1183_v36  ;;  %v443_v41 = vmax.f32 %v427_v38, 0.0 }
 0x133   :  { %v444_v42 = vmax.f32 %v428_v40, 0.0  ;;  %v1035_v43 = vpop.f32.mrb[12].mxu0 }
 0x134   :  { %v1036_v44 = vpop.f32.mrb[13].mxu0  ;;  %1128 = vmatpush3.bf16.msra.mxu1 %v1183_v36  ;;  %v1184_v36 = vld [vmem:[%s1501_s5 + $0x10] sm:$0xff]  }
 0x135   :  { %v1037_v45 = vadd.f32 %v1036_v44, %v1035_v43  ;;  %v1038_v46 = vpop.f32.mrb[14].mxu0  ;;  %v457_v47 = vpack.c.bf16 %v444_v42, %v443_v41  ;;  %1129 = vmatprep.subr.bf16.mxu1 %v1184_v36 }
 0x136   :  { %v1039_v48 = vpop.f32.mrb[15].mxu0 }
 0x137   :  { %v429_v49 = vadd.f32 %v1037_v45, %v1425_v11  ;;  %v1040_v50 = vadd.f32 %v1039_v48, %v1038_v46  ;;  %1113 = vmatprep.mubr.bf16.mxu1 %v457_v47 }
 0x138   :  { %1130 = vmatpush3.bf16.msra.mxu1 %v1184_v36 }
 0x139   :  { %v430_v51 = vadd.f32 %v1040_v50, %v1425_v11  ;;  %v445_v52 = vmax.f32 %v429_v49, 0.0  ;;  %1131 = vmatprep.subr.bf16.mxu1 %v1185_v37 }
 0x13b   :  { %v446_v53 = vmax.f32 %v430_v51, 0.0  ;;  %v1041_v54 = vpop.f32.mrb[16].mxu0 }
 0x13c   :  { %v1042_v55 = vpop.f32.mrb[17].mxu0  ;;  %1132 = vmatpush3.bf16.msra.mxu1 %v1185_v37 }
 0x13d   :  { %v1043_v56 = vadd.f32 %v1042_v55, %v1041_v54  ;;  %v1044_v57 = vpop.f32.mrb[18].mxu0  ;;  %v458_v58 = vpack.c.bf16 %v446_v53, %v445_v52 }
 0x13e   :  { %v1045_v59 = vpop.f32.mrb[19].mxu0 }
 0x13f   :  { %v431_v60 = vadd.f32 %v1043_v56, %v1425_v11  ;;  %v1046_v61 = vadd.f32 %v1045_v59, %v1044_v57  ;;  %1114 = vmatmul.mubr.bf16.gmra.mrb[4].mxu1 %v458_v58 }
 0x141   :  { %v432_v62 = vadd.f32 %v1046_v61, %v1425_v11  ;;  %v447_v63 = vmax.f32 %v431_v60, 0.0 }
 0x143   :  { %v448_v0 = vmax.f32 %v432_v62, 0.0  ;;  %v1047_v1 = vpop.f32.mrb[20].mxu0 }
 0x144   :  { %v1048_v2 = vpop.f32.mrb[21].mxu0 }
 0x145   :  { %v1049_v3 = vadd.f32 %v1048_v2, %v1047_v1  ;;  %v1050_v4 = vpop.f32.mrb[22].mxu0  ;;  %v459_v5 = vpack.c.bf16 %v448_v0, %v447_v63 }
 0x146   :  { %v1051_v6 = vpop.f32.mrb[23].mxu0 }
 0x147   :  { %v433_v7 = vadd.f32 %v1049_v3, %v1425_v11  ;;  %v1052_v8 = vadd.f32 %v1051_v6, %v1050_v4  ;;  %1117 = vmatprep.mubr.bf16.mxu1 %v459_v5 }
 0x149   :  { %v434_v9 = vadd.f32 %v1052_v8, %v1425_v11  ;;  %v449_v10 = vmax.f32 %v433_v7, 0.0 }
 0x14b   :  { %v450_v12 = vmax.f32 %v434_v9, 0.0  ;;  %v1053_v13 = vpop.f32.mrb[24].mxu0 }
 0x14c   :  { %v1054_v14 = vpop.f32.mrb[25].mxu0 }
 0x14d   :  { %v1055_v15 = vadd.f32 %v1054_v14, %v1053_v13  ;;  %v1056_v16 = vpop.f32.mrb[26].mxu0  ;;  %v460_v17 = vpack.c.bf16 %v450_v12, %v449_v10 }
 0x14e   :  { %v1057_v18 = vpop.f32.mrb[27].mxu0 }
 0x14f   :  { %v435_v19 = vadd.f32 %v1055_v15, %v1425_v11  ;;  %v1058_v20 = vadd.f32 %v1057_v18, %v1056_v16  ;;  %1118 = vmatmul.mubr.bf16.gmra.mrb[8].mxu1 %v460_v17 }
 0x151   :  { %v436_v21 = vadd.f32 %v1058_v20, %v1425_v11  ;;  %v451_v22 = vmax.f32 %v435_v19, 0.0 }
 0x153   :  { %v452_v23 = vmax.f32 %v436_v21, 0.0  ;;  %v1059_v24 = vpop.f32.mrb[28].mxu0 }
 0x154   :  { %v1060_v25 = vpop.f32.mrb[29].mxu0 }
 0x155   :  { %v1061_v26 = vadd.f32 %v1060_v25, %v1059_v24  ;;  %v1062_v27 = vpop.f32.mrb[30].mxu0  ;;  %v461_v28 = vpack.c.bf16 %v452_v23, %v451_v22 }
 0x156   :  { %v1063_v29 = vpop.f32.mrb[31].mxu0 }
 0x157   :  { %v437_v30 = vadd.f32 %v1061_v26, %v1425_v11  ;;  %v1064_v31 = vadd.f32 %v1063_v29, %v1062_v27  ;;  %1121 = vmatprep.mubr.bf16.mxu1 %v461_v28 }
 0x159   :  { %v438_v32 = vadd.f32 %v1064_v31, %v1425_v11  ;;  %v453_v33 = vmax.f32 %v437_v30, 0.0  ;;  %v963_v11 = vld [vmem:[%s1500_s4] ss:$0 sm:$0xff] }
 0x15a   :  { %v1466_v31 = vld [vmem:[%s1502_s6] ss:$0 sm:$0xff]  ;;  %s1328_s6 = smov [#allocation8]  }
 0x15b   :  { %v454_v34 = vmax.f32 %v438_v32, 0.0  ;;  %s933_s28 = sshll.u32 %s1328_s6, 4  ;;  %s934_s28 = int_to_ptr.vmem [resolvable:$true] %s933_s28 }
 0x15c   :  { %s1294_s29 = scalar_lea.vmem %s934_s28, 2048  ;;  %p1299_p3 = scmp.lt.s32.totalorder %s934_s28, %s934_s28 }
 0x15d   :  { %v462_v35 = vpack.c.bf16 %v454_v34, %v453_v33  ;;  %p1295_p2 = scmp.ne.s32.totalorder %s934_s28, %s1294_s29  ;;  %p1300_p4 = scmp.lt.s32.totalorder %s1294_s29, %s1294_s29 }
 0x15f   :  { %1122 = vmatmul.mubr.bf16.gmra.mrb[12].mxu1 %v462_v35  ;;  %p1301_p5 = por %p1300_p4, %p1299_p3 }
 0x161   :  { %p1302_p6 = pnand %p1301_p5, %p1295_p2 }
 0x202   :  { %v1111_v38 = vpop.f32.mrb[0].mxu1 }
 0x203   :  { %v577_v39 = vadd.f32 %v1111_v38, %v963_v11  ;;  %v568_v40 = vpop.f32.mrb[1].mxu1 }
 0x204   :  { %v569_v41 = vadd.f32 %v963_v11, %v568_v40  ;;  %v1112_v42 = vpop.f32.mrb[2].mxu1 }
 0x205   :  { %v580_v43 = vadd.f32 %v1112_v42, %v963_v11  ;;  %v571_v44 = vpop.f32.mrb[3].mxu1  ;;  %v633_v46 = vmax.f32 %v577_v39, 0.0 }
 0x206   :  { %v572_v45 = vadd.f32 %v963_v11, %v571_v44  ;;  %v631_v48 = vmax.f32 %v569_v41, 0.0 }
 0x207   :  { %v634_v47 = vmax.f32 %v580_v43, 0.0 }
 0x208   :  { %v632_v49 = vmax.f32 %v572_v45, 0.0 }
 0x209   :  { %v648_v50 = vpack.c.bf16 %v634_v47, %v633_v46 }
 0x20a   :  { %v647_v51 = vpack.c.bf16 %v632_v49, %v631_v48 }
 0x20c   :  { %1133 = vmatprep.mubr.msk.bf16.mxu1 %vm694_vm0, %v647_v51 }
 0x20d   :  { %1134 = vmatmul.mubr.msk.bf16.vlgmr.msra.gmra.mrb[16].mxu1 %vm694_vm0, %v648_v50 }
 0x212   :  { %v1115_v52 = vpop.f32.mrb[4].mxu1 }
 0x213   :  { %v593_v53 = vadd.f32 %v1115_v52, %v963_v11  ;;  %v584_v54 = vpop.f32.mrb[5].mxu1 }
 0x214   :  { %v585_v55 = vadd.f32 %v963_v11, %v584_v54  ;;  %v1116_v56 = vpop.f32.mrb[6].mxu1 }
 0x215   :  { %v596_v57 = vadd.f32 %v1116_v56, %v963_v11  ;;  %v587_v58 = vpop.f32.mrb[7].mxu1  ;;  %v637_v60 = vmax.f32 %v593_v53, 0.0 }
 0x216   :  { %v588_v59 = vadd.f32 %v963_v11, %v587_v58  ;;  %v635_v62 = vmax.f32 %v585_v55, 0.0 }
 0x217   :  { %v638_v61 = vmax.f32 %v596_v57, 0.0 }
 0x218   :  { %v636_v63 = vmax.f32 %v588_v59, 0.0 }
 0x219   :  { %v650_v0 = vpack.c.bf16 %v638_v61, %v637_v60 }
 0x21a   :  { %v649_v1 = vpack.c.bf16 %v636_v63, %v635_v62 }
 0x21c   :  { %1137 = vmatprep.mubr.msk.bf16.mxu1 %vm694_vm0, %v649_v1 }
 0x21d   :  { %1138 = vmatmul.mubr.msk.bf16.gmra.mrb[20].mxu1 %vm694_vm0, %v650_v0 }
 0x222   :  { %v1119_v2 = vpop.f32.mrb[8].mxu1 }
 0x223   :  { %v609_v3 = vadd.f32 %v1119_v2, %v963_v11  ;;  %v600_v4 = vpop.f32.mrb[9].mxu1 }
 0x224   :  { %v601_v5 = vadd.f32 %v963_v11, %v600_v4  ;;  %v1120_v6 = vpop.f32.mrb[10].mxu1 }
 0x225   :  { %v612_v7 = vadd.f32 %v1120_v6, %v963_v11  ;;  %v603_v8 = vpop.f32.mrb[11].mxu1  ;;  %v641_v10 = vmax.f32 %v609_v3, 0.0 }
 0x226   :  { %v604_v9 = vadd.f32 %v963_v11, %v603_v8  ;;  %v639_v13 = vmax.f32 %v601_v5, 0.0 }
 0x227   :  { %v642_v12 = vmax.f32 %v612_v7, 0.0 }
 0x228   :  { %v640_v14 = vmax.f32 %v604_v9, 0.0 }
 0x229   :  { %v652_v15 = vpack.c.bf16 %v642_v12, %v641_v10 }
 0x22a   :  { %v651_v16 = vpack.c.bf16 %v640_v14, %v639_v13 }
 0x22c   :  { %1141 = vmatprep.mubr.msk.bf16.mxu1 %vm694_vm0, %v651_v16 }
 0x22d   :  { %1142 = vmatmul.mubr.msk.bf16.gmra.mrb[24].mxu1 %vm694_vm0, %v652_v15 }
 0x232   :  { %v1123_v17 = vpop.f32.mrb[12].mxu1 }
 0x233   :  { %v625_v18 = vadd.f32 %v1123_v17, %v963_v11  ;;  %v616_v19 = vpop.f32.mrb[13].mxu1 }
 0x234   :  { %v617_v20 = vadd.f32 %v963_v11, %v616_v19  ;;  %v1124_v21 = vpop.f32.mrb[14].mxu1 }
 0x235   :  { %v628_v22 = vadd.f32 %v1124_v21, %v963_v11  ;;  %v619_v23 = vpop.f32.mrb[15].mxu1  ;;  %v645_v25 = vmax.f32 %v625_v18, 0.0 }
 0x236   :  { %v620_v24 = vadd.f32 %v963_v11, %v619_v23  ;;  %v643_v27 = vmax.f32 %v617_v20, 0.0 }
 0x237   :  { %v646_v26 = vmax.f32 %v628_v22, 0.0 }
 0x238   :  { %v644_v28 = vmax.f32 %v620_v24, 0.0 }
 0x239   :  { %v654_v29 = vpack.c.bf16 %v646_v26, %v645_v25 }
 0x23a   :  { %v653_v30 = vpack.c.bf16 %v644_v28, %v643_v27 }
 0x23c   :  { %1145 = vmatprep.mubr.msk.bf16.mxu1 %vm694_vm0, %v653_v30 }
 0x23d   :  { %1146 = vmatmul.mubr.msk.bf16.gmra.mrb[28].mxu1 %vm694_vm0, %v654_v29 }
 0x2e0   :  { %v1135_v32 = vpop.f32.mrb[16].mxu1 }
 0x2e1   :  { %v762_v33 = vadd.f32 %v1135_v32, %v1466_v31  ;;  %v753_v34 = vpop.f32.mrb[17].mxu1 }
 0x2e2   :  { %v754_v35 = vadd.f32 %v1466_v31, %v753_v34  ;;  %v1136_v36 = vpop.f32.mrb[18].mxu1 }
 0x2e3   :  { %v987_v37 = vmul.f32 -1.442695, %v762_v33  ;;  %v765_v11 = vadd.f32 %v1136_v36, %v1466_v31  ;;  %v756_v38 = vpop.f32.mrb[19].mxu1 }
 0x2e4   :  { %v985_v39 = vmul.f32 -1.442695, %v754_v35  ;;  %v757_v40 = vadd.f32 %v1466_v31, %v756_v38 }
 0x2e5   :  { %1186 = vpow2.f32 %v987_v37  ;;  %v988_v41 = vmul.f32 -1.442695, %v765_v11 }
 0x2e6   :  { %1188 = vpow2.f32 %v985_v39  ;;  %v986_v42 = vmul.f32 -1.442695, %v757_v40 }
 0x2e7   :  { %1190 = vpow2.f32 %v988_v41 }
 0x2e8   :  { %1192 = vpow2.f32 %v986_v42 }
 0x2ef   :  { %v1187_v43 = vpop.eup %1186 }
 0x2f0   :  { %v1189_v44 = vpop.eup %1188  ;;  %v866_v45 = vadd.f32 1.0, %v1187_v43  ;;  %v1139_v46 = vpop.f32.mrb[20].mxu1 }
 0x2f1   :  { %v1191_v47 = vpop.eup %1190  ;;  %v864_v48 = vadd.f32 1.0, %v1189_v44  ;;  %v778_v49 = vadd.f32 %v1139_v46, %v1466_v31  ;;  %v769_v50 = vpop.f32.mrb[21].mxu1 }
 0x2f2   :  { %v1193_v51 = vpop.eup %1192  ;;  %1194 = vrcp.f32 %v866_v45  ;;  %v867_v52 = vadd.f32 1.0, %v1191_v47  ;;  %v770_v53 = vadd.f32 %v1466_v31, %v769_v50  ;;  %v1140_v54 = vpop.f32.mrb[22].mxu1 }
 0x2f3   :  { %1196 = vrcp.f32 %v864_v48  ;;  %v865_v55 = vadd.f32 1.0, %v1193_v51  ;;  %v991_v56 = vmul.f32 -1.442695, %v778_v49  ;;  %v781_v57 = vadd.f32 %v1140_v54, %v1466_v31  ;;  %v772_v58 = vpop.f32.mrb[23].mxu1 }
 0x2f4   :  { %1198 = vrcp.f32 %v867_v52  ;;  %v989_v59 = vmul.f32 -1.442695, %v770_v53  ;;  %v773_v60 = vadd.f32 %v1466_v31, %v772_v58 }
 0x2f5   :  { %1200 = vrcp.f32 %v865_v55  ;;  %v992_v61 = vmul.f32 -1.442695, %v781_v57 }
 0x2f6   :  { %1202 = vpow2.f32 %v991_v56  ;;  %v990_v62 = vmul.f32 -1.442695, %v773_v60 }
 0x2f7   :  { %1204 = vpow2.f32 %v989_v59 }
 0x2f8   :  { %1206 = vpow2.f32 %v992_v61 }
 0x2f9   :  { %1208 = vpow2.f32 %v990_v62 }
 0x2fc   :  { %v1195_v63 = vpop.eup %1194 }
 0x2fd   :  { %v1197_v0 = vpop.eup %1196  ;;  %914 = vst [vmem:[#allocation8 + $0x10] sm:$0xff] %v1195_v63 }
 0x2fe   :  { %v1199_v1 = vpop.eup %1198  ;;  %912 = vst [vmem:[#allocation8] sm:$0xff] %v1197_v0 }
 0x2ff   :  { %v1201_v2 = vpop.eup %1200  ;;  %915 = vst [vmem:[#allocation8 + $0x18] sm:$0xff] %v1199_v1 }
 0x300   :  { %v1203_v3 = vpop.eup %1202  ;;  %913 = vst [vmem:[#allocation8 + $0x8] sm:$0xff] %v1201_v2  ;;  %v1143_v4 = vpop.f32.mrb[24].mxu1 }
 0x301   :  { %v1205_v5 = vpop.eup %1204  ;;  %v870_v6 = vadd.f32 1.0, %v1203_v3  ;;  %v794_v7 = vadd.f32 %v1143_v4, %v1466_v31  ;;  %v785_v8 = vpop.f32.mrb[25].mxu1 }
 0x302   :  { %v1207_v9 = vpop.eup %1206  ;;  %v868_v10 = vadd.f32 1.0, %v1205_v5  ;;  %v786_v12 = vadd.f32 %v1466_v31, %v785_v8  ;;  %v1144_v13 = vpop.f32.mrb[26].mxu1 }
 0x303   :  { %v1209_v14 = vpop.eup %1208  ;;  %1210 = vrcp.f32 %v870_v6  ;;  %v871_v15 = vadd.f32 1.0, %v1207_v9  ;;  %v995_v16 = vmul.f32 -1.442695, %v794_v7  ;;  %v797_v17 = vadd.f32 %v1144_v13, %v1466_v31  ;;  %v788_v18 = vpop.f32.mrb[27].mxu1 }
 0x304   :  { %1212 = vrcp.f32 %v868_v10  ;;  %v869_v19 = vadd.f32 1.0, %v1209_v14  ;;  %v993_v20 = vmul.f32 -1.442695, %v786_v12  ;;  %v789_v21 = vadd.f32 %v1466_v31, %v788_v18 }
 0x305   :  { %1214 = vrcp.f32 %v871_v15  ;;  %v996_v22 = vmul.f32 -1.442695, %v797_v17 }
 0x306   :  { %1216 = vrcp.f32 %v869_v19  ;;  %v994_v23 = vmul.f32 -1.442695, %v789_v21 }
 0x307   :  { %1218 = vpow2.f32 %v995_v16 }
 0x308   :  { %1220 = vpow2.f32 %v993_v20 }
 0x309   :  { %1222 = vpow2.f32 %v996_v22 }
 0x30a   :  { %1224 = vpow2.f32 %v994_v23 }
 0x30d   :  { %v1211_v24 = vpop.eup %1210 }
 0x30e   :  { %v1213_v25 = vpop.eup %1212  ;;  %918 = vst [vmem:[#allocation8 + $0x30] sm:$0xff] %v1211_v24 }
 0x30f   :  { %v1215_v26 = vpop.eup %1214  ;;  %916 = vst [vmem:[#allocation8 + $0x20] sm:$0xff] %v1213_v25 }
 0x310   :  { %v1217_v27 = vpop.eup %1216  ;;  %919 = vst [vmem:[#allocation8 + $0x38] sm:$0xff] %v1215_v26  ;;  %v1147_v28 = vpop.f32.mrb[28].mxu1 }
 0x311   :  { %v1219_v29 = vpop.eup %1218  ;;  %917 = vst [vmem:[#allocation8 + $0x28] sm:$0xff] %v1217_v27  ;;  %v810_v30 = vadd.f32 %v1147_v28, %v1466_v31  ;;  %v801_v32 = vpop.f32.mrb[29].mxu1 }
 0x312   :  { %v1221_v33 = vpop.eup %1220  ;;  %v874_v34 = vadd.f32 1.0, %v1219_v29  ;;  %v802_v35 = vadd.f32 %v1466_v31, %v801_v32  ;;  %v1148_v36 = vpop.f32.mrb[30].mxu1 }
 0x313   :  { %v1223_v37 = vpop.eup %1222  ;;  %v872_v11 = vadd.f32 1.0, %v1221_v33  ;;  %v813_v38 = vadd.f32 %v1148_v36, %v1466_v31  ;;  %v804_v39 = vpop.f32.mrb[31].mxu1  ;;  %v999_v42 = vmul.f32 -1.442695, %v810_v30 }
 0x314   :  { %v1225_v40 = vpop.eup %1224  ;;  %1226 = vrcp.f32 %v874_v34  ;;  %v875_v41 = vadd.f32 1.0, %v1223_v37  ;;  %v805_v43 = vadd.f32 %v1466_v31, %v804_v39  ;;  %v997_v45 = vmul.f32 -1.442695, %v802_v35 }
 0x315   :  { %1228 = vrcp.f32 %v872_v11  ;;  %v873_v44 = vadd.f32 1.0, %v1225_v40  ;;  %v1000_v46 = vmul.f32 -1.442695, %v813_v38 }
 0x316   :  { %1230 = vrcp.f32 %v875_v41  ;;  %v998_v47 = vmul.f32 -1.442695, %v805_v43 }
 0x317   :  { %1232 = vrcp.f32 %v873_v44 }
 0x318   :  { %1234 = vpow2.f32 %v999_v42 }
 0x319   :  { %1236 = vpow2.f32 %v997_v45 }
 0x31a   :  { %1238 = vpow2.f32 %v1000_v46 }
 0x31b   :  { %1240 = vpow2.f32 %v998_v47 }
 0x31e   :  { %v1227_v48 = vpop.eup %1226 }
 0x31f   :  { %v1229_v49 = vpop.eup %1228  ;;  %922 = vst [vmem:[#allocation8 + $0x50] sm:$0xff] %v1227_v48 }
 0x320   :  { %v1231_v50 = vpop.eup %1230  ;;  %920 = vst [vmem:[#allocation8 + $0x40] sm:$0xff] %v1229_v49 }
 0x321   :  { %v1233_v51 = vpop.eup %1232  ;;  %923 = vst [vmem:[#allocation8 + $0x58] sm:$0xff] %v1231_v50 }
 0x322   :  { %v1235_v52 = vpop.eup %1234  ;;  %921 = vst [vmem:[#allocation8 + $0x48] sm:$0xff] %v1233_v51 }
 0x323   :  { %v1237_v31 = vpop.eup %1236  ;;  %v878_v53 = vadd.f32 1.0, %v1235_v52 }
 0x324   :  { %v1239_v54 = vpop.eup %1238  ;;  %v876_v55 = vadd.f32 1.0, %v1237_v31 }
 0x325   :  { %v1241_v56 = vpop.eup %1240  ;;  %1242 = vrcp.f32 %v878_v53  ;;  %v879_v57 = vadd.f32 1.0, %v1239_v54 }
 0x326   :  { %1244 = vrcp.f32 %v876_v55  ;;  %v877_v58 = vadd.f32 1.0, %v1241_v56 }
 0x327   :  { %1246 = vrcp.f32 %v879_v57 }
 0x328   :  { %1248 = vrcp.f32 %v877_v58 }
 0x32f   :  { %v1243_v59 = vpop.eup %1242 }
 0x330   :  { %v1245_v60 = vpop.eup %1244  ;;  %926 = vst [vmem:[#allocation8 + $0x70] sm:$0xff] %v1243_v59 }
 0x331   :  { %v1247_v61 = vpop.eup %1246  ;;  %924 = vst [vmem:[#allocation8 + $0x60] sm:$0xff] %v1245_v60 }
 0x332   :  { %v1249_v62 = vpop.eup %1248  ;;  %927 = vst [vmem:[#allocation8 + $0x78] sm:$0xff] %v1247_v61 }
 0x333   :  { %925 = vst [vmem:[#allocation8 + $0x68] sm:$0xff] %v1249_v62 }
 0x334   :  { %1305 = shalt.err (!%p1302_p6)
}
 0x335   :  { %s1306_s9 = scalar_lea.hbm %s1503_s7, 2048 }
 0x336   :  { %p1307_p7 = scmp.ne.s32.totalorder %s1503_s7, %s1306_s9  ;;  %p1310_p8 = scmp.lt.u32.totalorder %s1306_s9, %s1503_s7 }
 0x338   :  { %p1312_p9 = pnand %p1310_p8, %p1307_p7 }
 0x33a   :  { %1315 = shalt.err (!%p1312_p9)
}
 0x33b   :  { %s1329_s14 = smov 128   ;;  %s1330_s15 = smov 8  }
 0x33c   :  { %939 = dma.vmem_to_hbm [thread:$0]  %s934_s28, 2048, %s1503_s7, [#allocation5], %s1329_s14, %s1329_s14, %s1330_s15  }
 0x33d   :  { %1320 = dma.done.wait [#allocation5], 2048  }
 0x33e   :  { %1321 = vsyncadd [#allocation5], 4294965248 }
 0x33f   :  { %943 = vsyncpa [#allocation4], 1 }
 0x340   :  { %944 = vsyncpa [#allocation7], 1 }
 0x341   :  { %945 = vsyncpa [#allocation5], 1 }

</bundles_post_ra>
